<compile_context>
chip_gen: v6e
topology: v6e:2x2x1
jax: 0.10.0
libtpu: 0.0.40
codegen_flags: <defaults>
</compile_context>

<pallas_src>
import jax
import jax.numpy as jnp
from jax.experimental import pallas as pl
from jax.experimental.pallas import tpu as pltpu


def _round_up(n, m):
    return ((n + m - 1) // m) * m


def _ff_kernel(x_ref, w1_ref, w2_ref, c_ref, o_ref):
    # fc1 on the MXU; f32 accumulation regardless of operand dtype.
    h = jnp.dot(x_ref[...], w1_ref[...], preferred_element_type=jnp.float32)
    # linear1: identity (see TODO at top of file).
    # fc2 has output width 1 -> VPU multiply + XLU lane reduce against the
    # lane-dense (1, H) w2 instead of a width-1 MXU matmul. The folded bias
    # c = b1.w2 + b2 is a scalar read from SMEM.
    o_col = jnp.sum(h * w2_ref[...], axis=-1, keepdims=True) + c_ref[0, 0]  # (tm, 1)
    # linear2: identity (see TODO at top of file).
    # Lane-dense store: transpose the (tm, 1) column into a (1, tm) row so the
    # writeback is an unmasked full-lane vst instead of 1/128-lane vst.msk.
    o_ref[...] = o_col.T.astype(o_ref.dtype)


def feed_forward(x, w1, b1, w2, b2, *, block_rows=1024, use_bf16=False):
    """x: [B, D_in] -> [B, 1] f32.

    w1: [D_in, H]   (PyTorch fc1.weight transposed)
    b1: [1, H]
    w2: [1, H]      (PyTorch fc2.weight, lane-dense)
    b2: [1, 1]
    """
    B, d_in = x.shape
    H = w1.shape[1]
    assert w1.shape == (d_in, H)
    assert b1.shape == (1, H)
    assert w2.shape == (1, H)
    assert b2.shape == (1, 1)
    assert block_rows % 128 == 0, "block_rows must be a multiple of 128"

    # Fold both biases into a single scalar (exact: the module is affine).
    c = (jnp.sum(b1 * w2, axis=-1, keepdims=True) + b2).astype(jnp.float32)
    w2 = w2.astype(jnp.float32)

    if use_bf16:
        # Cast once in the wrapper (NOT per grid step inside the kernel);
        # f32 accumulation is preserved via preferred_element_type.
        x = x.astype(jnp.bfloat16)
        w1 = w1.astype(jnp.bfloat16)

    # Batch tile: single block for small B; otherwise a multiple of 128
    # (lane-dense out block), capped at block_rows, with >= 2 grid steps so
    # the "parallel" batch axis can be sharded across v7x's two TensorCores.
    if B <= 128:
        tm = B
    else:
        tm = min(block_rows, _round_up(-(-B // 2), 128))
    num_tiles = pl.cdiv(B, tm)
    padded = num_tiles * tm

    # VMEM budget: x double-buffer + single-buffered weights + f32 fc1
    # activations + lane-dense out double-buffer, with slack; clamp to ~3/4 of
    # physical VMEM when it can be queried.
    vmem_need = (2 * tm * d_in * x.dtype.itemsize      # x double-buffer
                 + w1.size * w1.dtype.itemsize         # w1 (single-buffered)
                 + 2 * w2.size * w2.dtype.itemsize     # w2
                 + 2 * tm * 4                          # out row double-buffer
                 + tm * H * 4)                         # fc1 activations (f32)
    try:
        vmem_cap = pltpu.get_tpu_info().vmem_capacity_bytes
    except Exception:
        vmem_cap = 64 << 20
    vmem_limit = int(min(max(2 * vmem_need + (4 << 20), 32 << 20),
                         (vmem_cap * 3) // 4))

    def _in_specs(buffered):
        kw = dict(pipeline_mode=pl.Buffered(1)) if buffered else {}
        return [
            # x: tiled over the batch axis (software-pipelined stream).
            pl.BlockSpec((tm, d_in), lambda i: (i, 0)),
            # w1 / w2: constant index_map -> VMEM-resident across all steps.
            pl.BlockSpec((d_in, H), lambda i: (0, 0), **kw),
            pl.BlockSpec((1, H), lambda i: (0, 0), **kw),
            # folded bias scalar in SMEM.
            pl.BlockSpec((1, 1), lambda i: (0, 0),
                         memory_space=pltpu.MemorySpace.SMEM),
        ]

    def _run(buffered):
        return pl.pallas_call(
            _ff_kernel,
            out_shape=jax.ShapeDtypeStruct((1, padded), jnp.float32),
            grid=(num_tiles,),
            in_specs=_in_specs(buffered),
            out_specs=pl.BlockSpec((1, tm), lambda i: (0, i)),
            compiler_params=pltpu.CompilerParams(
                dimension_semantics=("parallel",),
                vmem_limit_bytes=vmem_limit),
        )(x, w1, w2, c)

    try:
        # Weights single-buffered: their block index never changes.
        out_row = _run(True)
    except Exception:
        # Fallback if pipeline_mode=pl.Buffered(1) is rejected by this
        # jax/Mosaic version; identical semantics, default double-buffering.
        out_row = _run(False)

    # Drop the padded tail columns and restore the (B, 1) PyTorch shape.
    return out_row[0, :B].reshape(B, 1)


def init_params(key, input_size, hidden_size):
    """Deterministic parameter init (uniform, PyTorch-Linear-style bounds)."""
    k1, k2, k3, k4 = jax.random.split(key, 4)
    bound1 = 1.0 / (input_size ** 0.5)
    bound2 = 1.0 / (hidden_size ** 0.5)
    # W1 stored as [in_features, out_features] (PyTorch weight transposed).
    w1 = jax.random.uniform(k1, (input_size, hidden_size), jnp.float32,
                            minval=-bound1, maxval=bound1)
    b1 = jax.random.uniform(k2, (1, hidden_size), jnp.float32,
                            minval=-bound1, maxval=bound1)
    # W2 stored lane-dense as [1, hidden_size] (== PyTorch fc2.weight layout).
    w2 = jax.random.uniform(k3, (1, hidden_size), jnp.float32,
                            minval=-bound2, maxval=bound2)
    b2 = jax.random.uniform(k4, (1, 1), jnp.float32,
                            minval=-bound2, maxval=bound2)
    return w1, b1, w2, b2


if __name__ == "__main__":
    key = jax.random.PRNGKey(0)
    kx, kp = jax.random.split(key)

    input_size = 32
    hidden_size = 32
    w1, b1, w2, b2 = init_params(kp, input_size, hidden_size)

    def ref_fn(xx):
        return (xx @ w1 + b1) @ w2.T + b2

    # Case 1: tiny batch (single grid step, tm == B).
    x = jax.random.normal(kx, (8, input_size), jnp.float32)
    out = jax.block_until_ready(feed_forward(x, w1, b1, w2, b2))
    assert out.shape == (8, 1)
    assert jnp.allclose(out, ref_fn(x), atol=1e-5, rtol=1e-5)

    # Case 2: batch-tiled grid (4 steps of 128 rows); resident weights,
    # lane-dense (1, 128) output rows, software-pipelined x tiles.
    x2 = jax.random.normal(jax.random.PRNGKey(1), (512, input_size),
                           jnp.float32)
    out2 = jax.block_until_ready(
        feed_forward(x2, w1, b1, w2, b2, block_rows=128))
    assert out2.shape == (512, 1)
    assert jnp.allclose(out2, ref_fn(x2), atol=1e-5, rtol=1e-5)

    # Case 3: B not a multiple of the tile (300 rows, tm=256, 2 grid steps);
    # the padded tail columns are discarded by the wrapper slice.
    x3 = jax.random.normal(jax.random.PRNGKey(2), (300, input_size),
                           jnp.float32)
    out3 = jax.block_until_ready(feed_forward(x3, w1, b1, w2, b2))
    assert out3.shape == (300, 1)
    assert jnp.allclose(out3, ref_fn(x3), atol=1e-5, rtol=1e-5)

    print("KERNEL_OK")
</pallas_src>

<mosaic_0001>
module attributes {stable_mosaic.version = 11 : i64} {
  func.func @_ff_kernel(%arg0: i32, %arg1: memref<8x32xf32, #tpu.memory_space<vmem>>, %arg2: memref<32x32xf32, #tpu.memory_space<vmem>>, %arg3: memref<1x32xf32, #tpu.memory_space<vmem>>, %arg4: memref<1x1xf32, #tpu.memory_space<smem>>, %arg5: memref<1x8xf32, #tpu.memory_space<vmem>>) attributes {dimension_semantics = [#tpu.dimension_semantics<parallel>], iteration_bounds = array<i64: 1>, scalar_prefetch = 0 : i64, scratch_operands = 0 : i64, tpu.core_type = #tpu.core_type<tc>, window_params = [{transform_indices = @transform_0, window_bounds = array<i64: 8, 32>}, {pipeline_mode = #tpu.pipeline_mode<synchronous>, transform_indices = @transform_1, window_bounds = array<i64: 32, 32>}, {pipeline_mode = #tpu.pipeline_mode<synchronous>, transform_indices = @transform_2, window_bounds = array<i64: 1, 32>}, {transform_indices = @transform_3, window_bounds = array<i64: 1, 1>}, {transform_indices = @transform_4, window_bounds = array<i64: 1, 8>}]} {
    %c0 = arith.constant 0 : index
    %c0_0 = arith.constant 0 : index
    %0 = vector.load %arg1[%c0, %c0_0] : memref<8x32xf32, #tpu.memory_space<vmem>>, vector<8x32xf32>
    %c0_1 = arith.constant 0 : index
    %c0_2 = arith.constant 0 : index
    %1 = vector.load %arg2[%c0_1, %c0_2] : memref<32x32xf32, #tpu.memory_space<vmem>>, vector<32x32xf32>
    %cst = arith.constant dense<0.000000e+00> : vector<8x32xf32>
    %2 = tpu.matmul %0, %1, %cst {dimension_numbers = #tpu.dot_dimension_numbers<[1], [0], [0], [1], [0, 0, 1, 1], [], []>} : vector<8x32xf32>, vector<32x32xf32>, vector<8x32xf32> -> vector<8x32xf32>
    %c0_3 = arith.constant 0 : index
    %c0_4 = arith.constant 0 : index
    %3 = vector.load %arg3[%c0_3, %c0_4] : memref<1x32xf32, #tpu.memory_space<vmem>>, vector<1x32xf32>
    %4 = vector.broadcast %3 : vector<1x32xf32> to vector<8x32xf32>
    %5 = arith.mulf %2, %4 : vector<8x32xf32>
    %cst_5 = arith.constant dense<0.000000e+00> : vector<8xf32>
    %6 = vector.multi_reduction <add>, %5, %cst_5 [1] : vector<8x32xf32> to vector<8xf32>
    %7 = vector.shape_cast %6 : vector<8xf32> to vector<8x1xf32>
    %c0_6 = arith.constant 0 : index
    %c0_7 = arith.constant 0 : index
    %8 = memref.load %arg4[%c0_6, %c0_7] : memref<1x1xf32, #tpu.memory_space<smem>>
    %9 = vector.broadcast %8 : f32 to vector<8x1xf32>
    %10 = arith.addf %7, %9 : vector<8x1xf32>
    %11 = tpu.transpose %10, [1, 0] : vector<8x1xf32> -> vector<1x8xf32>
    %c0_8 = arith.constant 0 : index
    %c0_9 = arith.constant 0 : index
    %12 = vector.load %arg5[%c0_8, %c0_9] : memref<1x8xf32, #tpu.memory_space<vmem>>, vector<1x8xf32>
    tpu.vector_store %arg5[%c0_8, %c0_9], %11 {strides = array<i32>} : memref<1x8xf32, #tpu.memory_space<vmem>>, vector<1x8xf32>,
    return
  }
  func.func @transform_0(%arg0: i32) -> (i32, i32) {
    %c0_i32 = arith.constant 0 : i32
    %c0_i32_0 = arith.constant 0 : i32
    return %arg0, %c0_i32 : i32, i32
  }
  func.func @transform_1(%arg0: i32) -> (i32, i32) {
    %c0_i32 = arith.constant 0 : i32
    %c0_i32_0 = arith.constant 0 : i32
    %c0_i32_1 = arith.constant 0 : i32
    return %c0_i32, %c0_i32_0 : i32, i32
  }
  func.func @transform_2(%arg0: i32) -> (i32, i32) {
    %c0_i32 = arith.constant 0 : i32
    %c0_i32_0 = arith.constant 0 : i32
    %c0_i32_1 = arith.constant 0 : i32
    return %c0_i32, %c0_i32_0 : i32, i32
  }
  func.func @transform_3(%arg0: i32) -> (i32, i32) {
    %c0_i32 = arith.constant 0 : i32
    %c0_i32_0 = arith.constant 0 : i32
    %c0_i32_1 = arith.constant 0 : i32
    return %c0_i32, %c0_i32_0 : i32, i32
  }
  func.func @transform_4(%arg0: i32) -> (i32, i32) {
    %c0_i32 = arith.constant 0 : i32
    %c0_i32_0 = arith.constant 0 : i32
    return %c0_i32, %arg0 : i32, i32
  }
}

module attributes {stable_mosaic.version = 11 : i64} {
  func.func @_ff_kernel(%arg0: i32, %arg1: memref<8x32xf32, #tpu.memory_space<vmem>>, %arg2: memref<32x32xf32, #tpu.memory_space<vmem>>, %arg3: memref<1x32xf32, #tpu.memory_space<vmem>>, %arg4: memref<1x1xf32, #tpu.memory_space<smem>>, %arg5: memref<1x8xf32, #tpu.memory_space<vmem>>) attributes {dimension_semantics = [#tpu.dimension_semantics<parallel>], iteration_bounds = array<i64: 1>, scalar_prefetch = 0 : i64, scratch_operands = 0 : i64, tpu.core_type = #tpu.core_type<tc>, window_params = [{transform_indices = @transform_0, window_bounds = array<i64: 8, 32>}, {pipeline_mode = #tpu.pipeline_mode<synchronous>, transform_indices = @transform_1, window_bounds = array<i64: 32, 32>}, {pipeline_mode = #tpu.pipeline_mode<synchronous>, transform_indices = @transform_2, window_bounds = array<i64: 1, 32>}, {transform_indices = @transform_3, window_bounds = array<i64: 1, 1>}, {transform_indices = @transform_4, window_bounds = array<i64: 1, 8>}]} {
    %c0 = arith.constant 0 : index
    %c0_0 = arith.constant 0 : index
    %0 = vector.load %arg1[%c0, %c0_0] : memref<8x32xf32, #tpu.memory_space<vmem>>, vector<8x32xf32>
    %c0_1 = arith.constant 0 : index
    %c0_2 = arith.constant 0 : index
    %1 = vector.load %arg2[%c0_1, %c0_2] : memref<32x32xf32, #tpu.memory_space<vmem>>, vector<32x32xf32>
    %cst = arith.constant dense<0.000000e+00> : vector<8x32xf32>
    %2 = tpu.matmul %0, %1, %cst {dimension_numbers = #tpu.dot_dimension_numbers<[1], [0], [0], [1], [0, 0, 1, 1], [], []>} : vector<8x32xf32>, vector<32x32xf32>, vector<8x32xf32> -> vector<8x32xf32>
    %c0_3 = arith.constant 0 : index
    %c0_4 = arith.constant 0 : index
    %3 = vector.load %arg3[%c0_3, %c0_4] : memref<1x32xf32, #tpu.memory_space<vmem>>, vector<1x32xf32>
    %4 = vector.broadcast %3 : vector<1x32xf32> to vector<8x32xf32>
    %5 = arith.mulf %2, %4 : vector<8x32xf32>
    %cst_5 = arith.constant dense<0.000000e+00> : vector<8xf32>
    %6 = vector.multi_reduction <add>, %5, %cst_5 [1] : vector<8x32xf32> to vector<8xf32>
    %7 = vector.shape_cast %6 : vector<8xf32> to vector<8x1xf32>
    %c0_6 = arith.constant 0 : index
    %c0_7 = arith.constant 0 : index
    %8 = memref.load %arg4[%c0_6, %c0_7] : memref<1x1xf32, #tpu.memory_space<smem>>
    %9 = vector.broadcast %8 : f32 to vector<8x1xf32>
    %10 = arith.addf %7, %9 : vector<8x1xf32>
    %11 = tpu.transpose %10, [1, 0] : vector<8x1xf32> -> vector<1x8xf32>
    %c0_8 = arith.constant 0 : index
    %c0_9 = arith.constant 0 : index
    %12 = vector.load %arg5[%c0_8, %c0_9] : memref<1x8xf32, #tpu.memory_space<vmem>>, vector<1x8xf32>
    tpu.vector_store %arg5[%c0_8, %c0_9], %11 {strides = array<i32>} : memref<1x8xf32, #tpu.memory_space<vmem>>, vector<1x8xf32>,
    return
  }
  func.func @transform_0(%arg0: i32) -> (i32, i32) {
    %c0_i32 = arith.constant 0 : i32
    %c0_i32_0 = arith.constant 0 : i32
    return %arg0, %c0_i32 : i32, i32
  }
  func.func @transform_1(%arg0: i32) -> (i32, i32) {
    %c0_i32 = arith.constant 0 : i32
    %c0_i32_0 = arith.constant 0 : i32
    %c0_i32_1 = arith.constant 0 : i32
    return %c0_i32, %c0_i32_0 : i32, i32
  }
  func.func @transform_2(%arg0: i32) -> (i32, i32) {
    %c0_i32 = arith.constant 0 : i32
    %c0_i32_0 = arith.constant 0 : i32
    %c0_i32_1 = arith.constant 0 : i32
    return %c0_i32, %c0_i32_0 : i32, i32
  }
  func.func @transform_3(%arg0: i32) -> (i32, i32) {
    %c0_i32 = arith.constant 0 : i32
    %c0_i32_0 = arith.constant 0 : i32
    %c0_i32_1 = arith.constant 0 : i32
    return %c0_i32, %c0_i32_0 : i32, i32
  }
  func.func @transform_4(%arg0: i32) -> (i32, i32) {
    %c0_i32 = arith.constant 0 : i32
    %c0_i32_0 = arith.constant 0 : i32
    return %c0_i32, %arg0 : i32, i32
  }
}

</mosaic_0001>

<bundles_post_ra>
// kernel: tpu_custom_call.1
= control target key start
LH: loop header
LB: loop body
LE: loop exit
PB: predicated region body
PF: predicated region fallthrough
CT: control target
= control target key end

     0   :  { %10 = vsyncpa [#allocation4], 0  ;;  %s326_s0 = inlined_call_operand.hbm [shape: f32[8,32], index: 0, kind: input, shape index: {}]   ;;  %s327_s1 = inlined_call_operand.hbm [shape: f32[32,32], index: 1, kind: input, shape index: {}]   ;;  %s328_s2 = inlined_call_operand.vmem [shape: f32[1,32], index: 2, kind: input, shape index: {}]   ;;  %s329_s3 = inlined_call_operand.<no memory space> [shape: f32[1,1], index: 3, kind: input, shape index: {}]   ;;  %s330_s4 = inlined_call_operand.hbm [shape: f32[1,8], index: 4, kind: output, shape index: {}]  }
   0x1   :  { %11 = vsyncpa [#allocation7], 0 }
   0x2   :  { %12 = vsyncpa [#allocation5], 0  ;;  %s279_s15 = smov [#allocation3]   ;;  %s280_s17 = smov [#allocation6]  }
   0x3   :  { %s19_s16 = sshll.u32 %s279_s15, 4  ;;  %s28_s18 = sshll.u32 %s280_s17, 4  ;;  %s20_s16 = int_to_ptr.vmem [resolvable:$true] %s19_s16  ;;  %s29_s18 = int_to_ptr.vmem [resolvable:$true] %s28_s18 }
   0x4   :  { %s221_s19 = scalar_lea.vmem %s20_s16, 128  ;;  %p226_p1 = scmp.lt.s32.totalorder %s20_s16, %s20_s16 }
   0x5   :  { %p222_p0 = scmp.ne.s32.totalorder %s20_s16, %s221_s19  ;;  %p227_p2 = scmp.lt.s32.totalorder %s221_s19, %s221_s19 }
   0x7   :  { %p228_p3 = por %p227_p2, %p226_p1 }
   0x9   :  { %p229_p4 = pnand %p228_p3, %p222_p0 }
   0xb   :  { %232 = shalt.err (!%p229_p4)
}
   0xc   :  { %22 = dma.hbm_to_vmem [thread:$0]  %s326_s0, 128, %s20_s16, [#allocation4]  }
   0xd   :  { %s241_s22 = scalar_lea.vmem %s29_s18, 512  ;;  %p246_p6 = scmp.lt.s32.totalorder %s29_s18, %s29_s18 }
   0xe   :  { %p242_p5 = scmp.ne.s32.totalorder %s29_s18, %s241_s22  ;;  %p247_p7 = scmp.lt.s32.totalorder %s241_s22, %s241_s22 }
  0x10   :  { %p248_p8 = por %p247_p7, %p246_p6 }
  0x12   :  { %p249_p9 = pnand %p248_p8, %p242_p5 }
  0x14   :  { %252 = shalt.err (!%p249_p9)
}
  0x15   :  { %s281_s23 = smov 128   ;;  %s282_s24 = smov 8  }
  0x16   :  { %34 = dma.hbm_to_vmem [thread:$0]  %s327_s1, 512, %s29_s18, [#allocation7], %s281_s23, %s281_s23, %s282_s24  }
  0x17   :  { %273 = dma.done.wait [#allocation4], 128  }
  0x18   :  { %274 = vsyncadd [#allocation4], 4294967168 }
  0x19   :  { %275 = dma.done.wait [#allocation7], 512  }
  0x1a   :  { %276 = vsyncadd [#allocation7], 4294966784  ;;  %v283_v0 = vmov 0.0   ;;  %vm284_vm0 = vmmov 0   ;;  %v49_v1 = vld [vmem:[#allocation6 + $0x18] sm:$0xff]  ;;  %v48_v2 = vld [vmem:[#allocation6 + $0x10] sm:$0xff]  ;;  %v136_v11 = vstv %s329_s3 }
  0x1b   :  { %195 = vmatprep.subr.mxu0 %v283_v0  ;;  %203 = vmatprep.mubr.msk.f32.mxu0 %vm284_vm0, %v283_v0  ;;  %v47_v3 = vld [vmem:[#allocation6 + $0x8] sm:$0xff]  ;;  %v46_v4 = vld [vmem:[#allocation6] sm:$0xff]  ;;  %v45_v5 = vld [vmem:[#allocation3] sm:$0xff]  ;;  %vm50_vm1 = vcmask 261120   ;;  %s285_s29 = smov [#allocation8]   ;;  %vm170_vm2 = vcmask 57344  }
  0x1c   :  { %196 = vmatpush3.msra.mxu0 %v49_v1  ;;  %v189_v6 = vld [vmem:[%s328_s2] ss:$0 sm:$0xff]  ;;  %s178_s30 = sshll.u32 %s285_s29, 4  ;;  %s179_s30 = int_to_ptr.vmem [resolvable:$true] %s178_s30 }
  0x1d   :  { %197 = vmatprep.subr.mxu0 %v283_v0  ;;  %s253_s5 = scalar_lea.vmem %s179_s30, 16  ;;  %s257_s2 = scalar_lea.vmem %s179_s30, 32 }
  0x1e   :  { %198 = vmatpush3.msra.mxu0 %v48_v2  ;;  %p254_p10 = scmp.ne.s32.totalorder %s179_s30, %s253_s5  ;;  %p258_p11 = scmp.lt.s32.totalorder %s179_s30, %s179_s30 }
  0x1f   :  { %199 = vmatprep.subr.mxu0 %v283_v0  ;;  %p259_p12 = scmp.lt.s32.totalorder %s257_s2, %s253_s5 }
  0x20   :  { %200 = vmatpush3.msra.mxu0 %v47_v3 }
  0x21   :  { %201 = vmatprep.subr.mxu0 %v283_v0  ;;  %p260_p13 = por %p259_p12, %p258_p11 }
  0x22   :  { %202 = vmatpush3.msra.mxu0 %v46_v4 }
  0x23   :  { %204 = vmatmul.mubr.msk.f32.vlgmr.msra.gmra.mxu0 %vm50_vm1, %v45_v5  ;;  %p261_p0 = pnand %p260_p13, %p254_p10 }
  0xe3   :  { %v120_v7 = vpop.f32.mrf.mxu0 }
  0xe4   :  { %v131_v8 = vmul.f32 %v189_v6, %v120_v7 }
  0xe5   :  { %v205_v9 = vpop.f32.mrf.mxu0 }
  0xe6   :  { %v132_v10 = vsel %vm50_vm1, %v131_v8, 0.0 }
  0xe7   :  { %133 = vadd.xlane.f32.xlu0 %v132_v10 }
 0x170   :  { %v134_v12 = vpop.xlane.xlu0 %133 }
 0x171   :  { %v137_v13 = vadd.f32 %v136_v11, %v134_v12 }
 0x173   :  { %138 = vxpose.xlu0.b32.start.end [1/1] (short) (narrow) %v137_v13, 8 }
 0x1ef   :  { %v154_v14 = vpop.trf.xlu0 }
 0x1f0   :  { %171 = vst.msk [vmem:[#allocation8] sm:$0x1] %vm170_vm2, %v154_v14 }
 0x1f1   :  { %264 = shalt.err (!%p261_p0)
}
 0x1f2   :  { %181 = dma.vmem_to_hbm [thread:$0]  %s179_s30, 16, %s330_s4, [#allocation5]  }
 0x1f3   :  { %277 = dma.done.wait [#allocation5], 16  }
 0x1f4   :  { %278 = vsyncadd [#allocation5], 4294967280 }
 0x1f5   :  { %185 = vsyncpa [#allocation4], 1 }
 0x1f6   :  { %186 = vsyncpa [#allocation7], 1 }
 0x1f7   :  { %187 = vsyncpa [#allocation5], 1 }

// kernel: tpu_custom_call.1
= control target key start
LH: loop header
LB: loop body
LE: loop exit
PB: predicated region body
PF: predicated region fallthrough
CT: control target
= control target key end

     0   :  { %10 = vsyncpa [#allocation4], 0  ;;  %s326_s0 = inlined_call_operand.hbm [shape: f32[8,32], index: 0, kind: input, shape index: {}]   ;;  %s327_s1 = inlined_call_operand.hbm [shape: f32[32,32], index: 1, kind: input, shape index: {}]   ;;  %s328_s2 = inlined_call_operand.vmem [shape: f32[1,32], index: 2, kind: input, shape index: {}]   ;;  %s329_s3 = inlined_call_operand.<no memory space> [shape: f32[1,1], index: 3, kind: input, shape index: {}]   ;;  %s330_s4 = inlined_call_operand.hbm [shape: f32[1,8], index: 4, kind: output, shape index: {}]  }
   0x1   :  { %11 = vsyncpa [#allocation7], 0 }
   0x2   :  { %12 = vsyncpa [#allocation5], 0  ;;  %s279_s15 = smov [#allocation3]   ;;  %s280_s17 = smov [#allocation6]  }
   0x3   :  { %s19_s16 = sshll.u32 %s279_s15, 4  ;;  %s28_s18 = sshll.u32 %s280_s17, 4  ;;  %s20_s16 = int_to_ptr.vmem [resolvable:$true] %s19_s16  ;;  %s29_s18 = int_to_ptr.vmem [resolvable:$true] %s28_s18 }
   0x4   :  { %s221_s19 = scalar_lea.vmem %s20_s16, 128  ;;  %p226_p1 = scmp.lt.s32.totalorder %s20_s16, %s20_s16 }
   0x5   :  { %p222_p0 = scmp.ne.s32.totalorder %s20_s16, %s221_s19  ;;  %p227_p2 = scmp.lt.s32.totalorder %s221_s19, %s221_s19 }
   0x7   :  { %p228_p3 = por %p227_p2, %p226_p1 }
   0x9   :  { %p229_p4 = pnand %p228_p3, %p222_p0 }
   0xb   :  { %232 = shalt.err (!%p229_p4)
}
   0xc   :  { %22 = dma.hbm_to_vmem [thread:$0]  %s326_s0, 128, %s20_s16, [#allocation4]  }
   0xd   :  { %s241_s22 = scalar_lea.vmem %s29_s18, 512  ;;  %p246_p6 = scmp.lt.s32.totalorder %s29_s18, %s29_s18 }
   0xe   :  { %p242_p5 = scmp.ne.s32.totalorder %s29_s18, %s241_s22  ;;  %p247_p7 = scmp.lt.s32.totalorder %s241_s22, %s241_s22 }
  0x10   :  { %p248_p8 = por %p247_p7, %p246_p6 }
  0x12   :  { %p249_p9 = pnand %p248_p8, %p242_p5 }
  0x14   :  { %252 = shalt.err (!%p249_p9)
}
  0x15   :  { %s281_s23 = smov 128   ;;  %s282_s24 = smov 8  }
  0x16   :  { %34 = dma.hbm_to_vmem [thread:$0]  %s327_s1, 512, %s29_s18, [#allocation7], %s281_s23, %s281_s23, %s282_s24  }
  0x17   :  { %273 = dma.done.wait [#allocation4], 128  }
  0x18   :  { %274 = vsyncadd [#allocation4], 4294967168 }
  0x19   :  { %275 = dma.done.wait [#allocation7], 512  }
  0x1a   :  { %276 = vsyncadd [#allocation7], 4294966784  ;;  %v283_v0 = vmov 0.0   ;;  %vm284_vm0 = vmmov 0   ;;  %v49_v1 = vld [vmem:[#allocation6 + $0x18] sm:$0xff]  ;;  %v48_v2 = vld [vmem:[#allocation6 + $0x10] sm:$0xff]  ;;  %v136_v11 = vstv %s329_s3 }
  0x1b   :  { %195 = vmatprep.subr.mxu0 %v283_v0  ;;  %203 = vmatprep.mubr.msk.f32.mxu0 %vm284_vm0, %v283_v0  ;;  %v47_v3 = vld [vmem:[#allocation6 + $0x8] sm:$0xff]  ;;  %v46_v4 = vld [vmem:[#allocation6] sm:$0xff]  ;;  %v45_v5 = vld [vmem:[#allocation3] sm:$0xff]  ;;  %vm50_vm1 = vcmask 261120   ;;  %s285_s29 = smov [#allocation8]   ;;  %vm170_vm2 = vcmask 57344  }
  0x1c   :  { %196 = vmatpush3.msra.mxu0 %v49_v1  ;;  %v189_v6 = vld [vmem:[%s328_s2] ss:$0 sm:$0xff]  ;;  %s178_s30 = sshll.u32 %s285_s29, 4  ;;  %s179_s30 = int_to_ptr.vmem [resolvable:$true] %s178_s30 }
  0x1d   :  { %197 = vmatprep.subr.mxu0 %v283_v0  ;;  %s253_s5 = scalar_lea.vmem %s179_s30, 16  ;;  %s257_s2 = scalar_lea.vmem %s179_s30, 32 }
  0x1e   :  { %198 = vmatpush3.msra.mxu0 %v48_v2  ;;  %p254_p10 = scmp.ne.s32.totalorder %s179_s30, %s253_s5  ;;  %p258_p11 = scmp.lt.s32.totalorder %s179_s30, %s179_s30 }
  0x1f   :  { %199 = vmatprep.subr.mxu0 %v283_v0  ;;  %p259_p12 = scmp.lt.s32.totalorder %s257_s2, %s253_s5 }
  0x20   :  { %200 = vmatpush3.msra.mxu0 %v47_v3 }
  0x21   :  { %201 = vmatprep.subr.mxu0 %v283_v0  ;;  %p260_p13 = por %p259_p12, %p258_p11 }
  0x22   :  { %202 = vmatpush3.msra.mxu0 %v46_v4 }
  0x23   :  { %204 = vmatmul.mubr.msk.f32.vlgmr.msra.gmra.mxu0 %vm50_vm1, %v45_v5  ;;  %p261_p0 = pnand %p260_p13, %p254_p10 }
  0xe3   :  { %v120_v7 = vpop.f32.mrf.mxu0 }
  0xe4   :  { %v131_v8 = vmul.f32 %v189_v6, %v120_v7 }
  0xe5   :  { %v205_v9 = vpop.f32.mrf.mxu0 }
  0xe6   :  { %v132_v10 = vsel %vm50_vm1, %v131_v8, 0.0 }
  0xe7   :  { %133 = vadd.xlane.f32.xlu0 %v132_v10 }
 0x170   :  { %v134_v12 = vpop.xlane.xlu0 %133 }
 0x171   :  { %v137_v13 = vadd.f32 %v136_v11, %v134_v12 }
 0x173   :  { %138 = vxpose.xlu0.b32.start.end [1/1] (short) (narrow) %v137_v13, 8 }
 0x1ef   :  { %v154_v14 = vpop.trf.xlu0 }
 0x1f0   :  { %171 = vst.msk [vmem:[#allocation8] sm:$0x1] %vm170_vm2, %v154_v14 }
 0x1f1   :  { %264 = shalt.err (!%p261_p0)
}
 0x1f2   :  { %181 = dma.vmem_to_hbm [thread:$0]  %s179_s30, 16, %s330_s4, [#allocation5]  }
 0x1f3   :  { %277 = dma.done.wait [#allocation5], 16  }
 0x1f4   :  { %278 = vsyncadd [#allocation5], 4294967280 }
 0x1f5   :  { %185 = vsyncpa [#allocation4], 1 }
 0x1f6   :  { %186 = vsyncpa [#allocation7], 1 }
 0x1f7   :  { %187 = vsyncpa [#allocation5], 1 }

</bundles_post_ra>
